<compile_context>
chip_gen: v6e
topology: v6e:2x2x1
jax: 0.10.0
libtpu: 0.0.40
codegen_flags: <defaults>
</compile_context>

<pallas_src>
import functools

import jax
import jax.numpy as jnp
from jax import lax
from jax.experimental import pallas as pl
from jax.experimental.pallas import tpu as pltpu


_OUT_ROWS = 8  # sublane-aligned output rows: [mu(0..O-1), value(O), padding]


# ----------------------------------------------------------------------------
# Kernel
# ----------------------------------------------------------------------------
def _actor_critic_kernel(x_ref, w1t_ref, b1t_ref, w2t_ref, b2t_ref, out_ref, *,
                         num_outputs, output_scale, apply_scale):
    """Fused forward of both heads on one batch tile, transposed output.

    x_ref   : (tb, I)      input rows (stored dtype; cast in-kernel if needed)
    w1t_ref : (2H, I)      [actor|critic] first-layer weights, transposed
    b1t_ref : (2H, 1)
    w2t_ref : (8, 2H)      block-diag second layer, transposed, sublane-padded
    b2t_ref : (8, 1)
    out_ref : (8, tb)      sublanes 0..O-1 = tanh(mu_raw)*scale, sublane O = value
    """
    x = x_ref[...]
    if x.dtype != w1t_ref.dtype:
        x = x.astype(w1t_ref.dtype)            # in-kernel cast (free VPU slot)

    # h^T = relu(W1^T @ x^T + b1^T): contract W1t dim 1 (I) with x dim 1 (I).
    h_t = lax.dot_general(
        w1t_ref[...], x,
        dimension_numbers=(((1,), (1,)), ((), ())),
        preferred_element_type=jnp.float32) + b1t_ref[...]
    h_t = jnp.maximum(h_t, 0.0)                                   # (2H, tb)

    # y^T = W2^T @ h^T + b2^T  (block-diagonal W2 -> [mu_raw | value | pad]).
    y_t = jnp.dot(w2t_ref[...], h_t.astype(w2t_ref.dtype),
                  preferred_element_type=jnp.float32) + b2t_ref[...]  # (8, tb)

    # tanh (+ optional static scale) applies only to the actor sublanes.
    row = lax.broadcasted_iota(jnp.int32, y_t.shape, 0)
    mu = jnp.tanh(y_t)
    if apply_scale:
        mu = mu * output_scale
    out_ref[...] = jnp.where(row < num_outputs, mu, y_t).astype(out_ref.dtype)


# ----------------------------------------------------------------------------
# Parameter packing -- call ONCE at init / after each optimizer step.
# ----------------------------------------------------------------------------
def pack_params(params, compute_dtype=jnp.float32):
    """Pack both heads into transposed fused weights (outside the hot path)."""
    aw1, ab1 = params["aw1"], params["ab1"]        # (I,H), (1,H)
    aw2, ab2 = params["aw2"], params["ab2"]        # (H,O), (1,O)
    cw1, cb1 = params["cw1"], params["cb1"]        # (I,H), (1,H)
    cw2, cb2 = params["cw2"], params["cb2"]        # (H,1), (1,1)

    _, hidden = aw1.shape
    num_outputs = aw2.shape[1]
    assert num_outputs + 1 <= _OUT_ROWS, "output rows exceed sublane tile"

    w1t = jnp.concatenate([aw1, cw1], axis=1).T.astype(compute_dtype)   # (2H, I)
    b1t = jnp.concatenate([ab1, cb1], axis=1).T.astype(jnp.float32)     # (2H, 1)

    # Block-diagonal second layer (zeros are exact, so results match exactly).
    w2t = jnp.zeros((_OUT_ROWS, 2 * hidden), jnp.float32)
    w2t = w2t.at[:num_outputs, :hidden].set(aw2.T)
    w2t = w2t.at[num_outputs, hidden:].set(cw2[:, 0])
    w2t = w2t.astype(compute_dtype)                                     # (8, 2H)

    b2t = jnp.zeros((_OUT_ROWS, 1), jnp.float32)
    b2t = b2t.at[:num_outputs, 0].set(ab2[0])
    b2t = b2t.at[num_outputs, 0].set(cb2[0, 0])                         # (8, 1)

    return {"w1t": w1t, "b1t": b1t, "w2t": w2t, "b2t": b2t}


# ----------------------------------------------------------------------------
# Batch tiling
# ----------------------------------------------------------------------------
def _round_up(n, m):
    return ((n + m - 1) // m) * m


def _batch_tiling(B, block_b):
    """Return (tb, b_pad, grid). Large B -> >=2 grid steps (v7x megacore)."""
    if B <= 256:
        b_pad = _round_up(B, 8)          # single full-array block, grid = 1
        return b_pad, b_pad, 1
    block_b = max(128, _round_up(block_b, 128))
    tb = min(block_b, _round_up(pl.cdiv(B, 2), 128))   # >=2 steps for 2 TCs
    grid = pl.cdiv(B, tb)
    return tb, grid * tb, grid


# ----------------------------------------------------------------------------
# Forward wrapper (hot path): takes packed params, does ONE pallas_call.
# ----------------------------------------------------------------------------
def actor_critic_forward(x, packed, *, num_outputs, output_scale=1.0, std=1e-4,
                         deterministic=False, block_b=512,
                         vmem_limit_bytes=None):
    """Reproduces ActorCritic.forward.

    Returns ((mu, std_vec), value) when not deterministic, else (mu, value).
    `output_scale` must be a static Python number (baked at trace time).
    """
    B, num_inputs = x.shape
    w1t, b1t, w2t, b2t = packed["w1t"], packed["b1t"], packed["w2t"], packed["b2t"]

    tb, b_pad, grid = _batch_tiling(B, block_b)
    x_p = jnp.pad(x, ((0, b_pad - B), (0, 0))) if b_pad != B else x

    kernel = functools.partial(
        _actor_critic_kernel,
        num_outputs=num_outputs,
        output_scale=float(output_scale),
        apply_scale=(float(output_scale) != 1.0),
    )

    # Weights are tiny: constant index_map keeps them resident (no re-DMA).
    res = lambda shape: pl.BlockSpec(shape, lambda i: (0, 0))

    out = pl.pallas_call(
        kernel,
        out_shape=jax.ShapeDtypeStruct((_OUT_ROWS, b_pad), jnp.float32),
        grid=(grid,),
        in_specs=[
            pl.BlockSpec((tb, num_inputs), lambda i: (i, 0)),
            res(w1t.shape), res(b1t.shape), res(w2t.shape), res(b2t.shape),
        ],
        out_specs=pl.BlockSpec((_OUT_ROWS, tb), lambda i: (0, i)),
        compiler_params=pltpu.CompilerParams(
            dimension_semantics=("parallel",),
            vmem_limit_bytes=vmem_limit_bytes),
    )(x_p, w1t, b1t, w2t, b2t)

    mu = out[:num_outputs, :B].T                       # (B, O)
    value = out[num_outputs, :B][:, None]              # (B, 1)

    if deterministic:
        return mu, value
    # Normal(mu, std): std is a constant vector broadcast against mu.
    std_vec = jnp.full((num_outputs,), std, dtype=jnp.float32)
    return (mu, std_vec), value


# ----------------------------------------------------------------------------
# Param init (mirrors init_weights(): N(0, 0.1) weights, 0.1 biases)
# ----------------------------------------------------------------------------
def init_params(key, num_inputs, num_outputs, hidden_size):
    k1, k2, k3, k4 = jax.random.split(key, 4)
    w = lambda k, i, o: (0.1 * jax.random.normal(k, (i, o))).astype(jnp.float32)
    b = lambda o: jnp.full((1, o), 0.1, dtype=jnp.float32)
    return {
        "aw1": w(k1, num_inputs, hidden_size), "ab1": b(hidden_size),
        "aw2": w(k2, hidden_size, num_outputs), "ab2": b(num_outputs),
        "cw1": w(k3, num_inputs, hidden_size), "cb1": b(hidden_size),
        "cw2": w(k4, hidden_size, 1), "cb2": b(1),
    }


def _reference(x, params, output_scale):
    h_a = jnp.maximum(x @ params["aw1"] + params["ab1"], 0.0)
    mu = jnp.tanh(h_a @ params["aw2"] + params["ab2"]) * output_scale
    h_c = jnp.maximum(x @ params["cw1"] + params["cb1"], 0.0)
    v = h_c @ params["cw2"] + params["cb2"]
    return mu, v


if __name__ == "__main__":
    key = jax.random.PRNGKey(0)
    k_x, k_p, k_x2 = jax.random.split(key, 3)

    B, NUM_INPUTS, HIDDEN, NUM_OUTPUTS = 8, 32, 32, 2
    OUTPUT_SCALE, STD = 1.0, 1e-4

    x = jax.random.normal(k_x, (B, NUM_INPUTS), dtype=jnp.float32)
    params = init_params(k_p, NUM_INPUTS, NUM_OUTPUTS, HIDDEN)

    # Pack ONCE (outside the hot path); jit the forward with static config.
    packed = pack_params(params)
    packed_bf16 = pack_params(params, compute_dtype=jnp.bfloat16)

    fwd = jax.jit(functools.partial(
        actor_critic_forward, num_outputs=NUM_OUTPUTS,
        output_scale=OUTPUT_SCALE, std=STD))
    fwd_det = jax.jit(functools.partial(
        actor_critic_forward, num_outputs=NUM_OUTPUTS,
        output_scale=OUTPUT_SCALE, deterministic=True))

    # --- fp32 path, small batch (grid = 1) ---
    (mu, std_vec), value = fwd(x, packed)
    jax.block_until_ready((mu, std_vec, value))

    mu_ref, v_ref = _reference(x, params, OUTPUT_SCALE)
    assert mu.shape == (B, NUM_OUTPUTS) and value.shape == (B, 1)
    assert jnp.allclose(mu, mu_ref, atol=1e-4, rtol=1e-4), "actor mismatch (fp32)"
    assert jnp.allclose(value, v_ref, atol=1e-4, rtol=1e-4), "critic mismatch (fp32)"
    assert jnp.allclose(std_vec, STD), "std mismatch"

    # --- larger batch exercising >=2 grid steps + batch padding ---
    B2 = 260
    x2 = jax.random.normal(k_x2, (B2, NUM_INPUTS), dtype=jnp.float32)
    mu2, v2 = fwd_det(x2, packed)
    jax.block_until_ready((mu2, v2))
    mu2_ref, v2_ref = _reference(x2, params, OUTPUT_SCALE)
    assert mu2.shape == (B2, NUM_OUTPUTS) and v2.shape == (B2, 1)
    assert jnp.allclose(mu2, mu2_ref, atol=1e-4, rtol=1e-4), "actor mismatch (gridded)"
    assert jnp.allclose(v2, v2_ref, atol=1e-4, rtol=1e-4), "critic mismatch (gridded)"

    # --- optional bf16 weight path (x stays f32 in HBM; cast happens in-kernel) ---
    mu3, v3 = fwd_det(x2, packed_bf16)
    jax.block_until_ready((mu3, v3))
    assert jnp.allclose(mu3, mu2_ref, atol=5e-2, rtol=5e-2), "actor mismatch (bf16)"
    assert jnp.allclose(v3, v2_ref, atol=5e-2, rtol=5e-2), "critic mismatch (bf16)"

    print("KERNEL_OK")
</pallas_src>

<mosaic_0001>
module attributes {stable_mosaic.version = 11 : i64} {
  func.func @_actor_critic_kernel(%arg0: i32, %arg1: memref<8x32xf32, #tpu.memory_space<vmem>>, %arg2: memref<64x32xf32, #tpu.memory_space<vmem>>, %arg3: memref<64x1xf32, #tpu.memory_space<vmem>>, %arg4: memref<8x64xf32, #tpu.memory_space<vmem>>, %arg5: memref<8x1xf32, #tpu.memory_space<vmem>>, %arg6: memref<8x8xf32, #tpu.memory_space<vmem>>) attributes {dimension_semantics = [#tpu.dimension_semantics<parallel>], iteration_bounds = array<i64: 1>, scalar_prefetch = 0 : i64, scratch_operands = 0 : i64, tpu.core_type = #tpu.core_type<tc>, window_params = [{transform_indices = @transform_0, window_bounds = array<i64: 8, 32>}, {pipeline_mode = #tpu.pipeline_mode<synchronous>, transform_indices = @transform_1, window_bounds = array<i64: 64, 32>}, {pipeline_mode = #tpu.pipeline_mode<synchronous>, transform_indices = @transform_2, window_bounds = array<i64: 64, 1>}, {pipeline_mode = #tpu.pipeline_mode<synchronous>, transform_indices = @transform_3, window_bounds = array<i64: 8, 64>}, {pipeline_mode = #tpu.pipeline_mode<synchronous>, transform_indices = @transform_4, window_bounds = array<i64: 8, 1>}, {transform_indices = @transform_5, window_bounds = array<i64: 8, 8>}]} {
    %c0 = arith.constant 0 : index
    %c0_0 = arith.constant 0 : index
    %0 = vector.load %arg1[%c0, %c0_0] : memref<8x32xf32, #tpu.memory_space<vmem>>, vector<8x32xf32>
    %c0_1 = arith.constant 0 : index
    %c0_2 = arith.constant 0 : index
    %1 = vector.load %arg2[%c0_1, %c0_2] : memref<64x32xf32, #tpu.memory_space<vmem>>, vector<64x32xf32>
    %cst = arith.constant dense<0.000000e+00> : vector<64x8xf32>
    %2 = tpu.matmul %1, %0, %cst {dimension_numbers = #tpu.dot_dimension_numbers<[1], [1], [0], [0], [0, 0, 1, 0], [], []>} : vector<64x32xf32>, vector<8x32xf32>, vector<64x8xf32> -> vector<64x8xf32>
    %c0_3 = arith.constant 0 : index
    %c0_4 = arith.constant 0 : index
    %3 = vector.load %arg3[%c0_3, %c0_4] : memref<64x1xf32, #tpu.memory_space<vmem>>, vector<64x1xf32>
    %4 = vector.broadcast %3 : vector<64x1xf32> to vector<64x8xf32>
    %5 = arith.addf %2, %4 : vector<64x8xf32>
    %cst_5 = arith.constant 0.000000e+00 : f32
    %6 = vector.broadcast %cst_5 : f32 to vector<64x8xf32>
    %7 = arith.maximumf %5, %6 : vector<64x8xf32>
    %c0_6 = arith.constant 0 : index
    %c0_7 = arith.constant 0 : index
    %8 = vector.load %arg4[%c0_6, %c0_7] : memref<8x64xf32, #tpu.memory_space<vmem>>, vector<8x64xf32>
    %cst_8 = arith.constant dense<0.000000e+00> : vector<8x8xf32>
    %9 = tpu.matmul %8, %7, %cst_8 {dimension_numbers = #tpu.dot_dimension_numbers<[1], [0], [0], [1], [0, 0, 1, 1], [], []>} : vector<8x64xf32>, vector<64x8xf32>, vector<8x8xf32> -> vector<8x8xf32>
    %c0_9 = arith.constant 0 : index
    %c0_10 = arith.constant 0 : index
    %10 = vector.load %arg5[%c0_9, %c0_10] : memref<8x1xf32, #tpu.memory_space<vmem>>, vector<8x1xf32>
    %11 = vector.broadcast %10 : vector<8x1xf32> to vector<8x8xf32>
    %12 = arith.addf %9, %11 : vector<8x8xf32>
    %13 = tpu.iota {dimensions = array<i32: 0>} : vector<8x8xi32>
    %14 = math.tanh %12 : vector<8x8xf32>
    %c2_i32 = arith.constant 2 : i32
    %15 = vector.broadcast %c2_i32 : i32 to vector<8x8xi32>
    %16 = arith.cmpi slt, %13, %15 : vector<8x8xi32>
    %17 = arith.select %16, %14, %12 : vector<8x8xi1>, vector<8x8xf32>
    %c0_11 = arith.constant 0 : index
    %c0_12 = arith.constant 0 : index
    %18 = vector.load %arg6[%c0_11, %c0_12] : memref<8x8xf32, #tpu.memory_space<vmem>>, vector<8x8xf32>
    tpu.vector_store %arg6[%c0_11, %c0_12], %17 {strides = array<i32>} : memref<8x8xf32, #tpu.memory_space<vmem>>, vector<8x8xf32>,
    return
  }
  func.func @transform_0(%arg0: i32) -> (i32, i32) {
    %c0_i32 = arith.constant 0 : i32
    %c0_i32_0 = arith.constant 0 : i32
    return %arg0, %c0_i32 : i32, i32
  }
  func.func @transform_1(%arg0: i32) -> (i32, i32) {
    %c0_i32 = arith.constant 0 : i32
    %c0_i32_0 = arith.constant 0 : i32
    %c0_i32_1 = arith.constant 0 : i32
    return %c0_i32, %c0_i32_0 : i32, i32
  }
  func.func @transform_2(%arg0: i32) -> (i32, i32) {
    %c0_i32 = arith.constant 0 : i32
    %c0_i32_0 = arith.constant 0 : i32
    %c0_i32_1 = arith.constant 0 : i32
    return %c0_i32, %c0_i32_0 : i32, i32
  }
  func.func @transform_3(%arg0: i32) -> (i32, i32) {
    %c0_i32 = arith.constant 0 : i32
    %c0_i32_0 = arith.constant 0 : i32
    %c0_i32_1 = arith.constant 0 : i32
    return %c0_i32, %c0_i32_0 : i32, i32
  }
  func.func @transform_4(%arg0: i32) -> (i32, i32) {
    %c0_i32 = arith.constant 0 : i32
    %c0_i32_0 = arith.constant 0 : i32
    %c0_i32_1 = arith.constant 0 : i32
    return %c0_i32, %c0_i32_0 : i32, i32
  }
  func.func @transform_5(%arg0: i32) -> (i32, i32) {
    %c0_i32 = arith.constant 0 : i32
    %c0_i32_0 = arith.constant 0 : i32
    return %c0_i32, %arg0 : i32, i32
  }
}

</mosaic_0001>

<bundles_post_ra>
// kernel: actor_critic_forward.1
= control target key start
LH: loop header
LB: loop body
LE: loop exit
PB: predicated region body
PF: predicated region fallthrough
CT: control target
= control target key end

     0   :  { %vm77_vm0 = vcmask 261120   ;;  %v378_v2 = vmov 0   ;;  %v379_v19 = vmov 0.0   ;;  %vm380_vm1 = vmmov 0   ;;  %s481_s0 = inlined_call_operand.vmem [shape: f32[8,32], index: 0, kind: input, shape index: {}]   ;;  %s482_s1 = inlined_call_operand.vmem [shape: f32[64,32], index: 1, kind: input, shape index: {}]   ;;  %s483_s2 = inlined_call_operand.vmem [shape: f32[64,1], index: 2, kind: input, shape index: {}]   ;;  %s484_s4 = inlined_call_operand.vmem [shape: f32[8,1], index: 4, kind: input, shape index: {}]   ;;  %s485_s3 = inlined_call_operand.vmem [shape: f32[8,64], index: 3, kind: input, shape index: {}]   ;;  %s486_s5 = inlined_call_operand.vmem [shape: f32[8,8], index: 5, kind: output, shape index: {}]  }
   0x1   :  { %v20_v0 = vld [vmem:[%s481_s0] sm:$0xff]  ;;  %374 = vset.pattern.permute.xlu0 %v378_v2  ;;  %375 = vset.pattern.permute.xlu1 %v378_v2  ;;  %v22_v3 = vld [vmem:[%s482_s1 + $0x8] sm:$0xff]  ;;  %v23_v4 = vld [vmem:[%s482_s1 + $0x10] sm:$0xff]  ;;  %vm225_vm2 = vcmask 523264   ;;  %v299_v57 = vlaneseq  ;;  %vm304_vm4 = vcmask 64512  }
   0x2   :  { %v21_v1 = vld [vmem:[%s482_s1] sm:$0xff]  ;;  %338 = vmatprep.subr.msk.mxu0 %vm77_vm0, %v20_v0  ;;  %v36_v5 = vld [vmem:[%s483_s2 + $0x38] sm:$0xff]  ;;  %v34_v6 = vld [vmem:[%s483_s2 + $0x28] sm:$0xff]  ;;  %352 = vmatprep.subr.mxu1 %v379_v19 }
   0x3   :  { %340 = vmatprep.mubr.msk.f32.mxu0 %vm77_vm0, %v21_v1  ;;  %339 = vmatpush3.xpose.msk.msra.mxu0 %vm77_vm0, %v20_v0  ;;  %v35_v7 = vld [vmem:[%s483_s2 + $0x30] sm:$0xff]  ;;  %v33_v8 = vld [vmem:[%s483_s2 + $0x20] sm:$0xff]  ;;  %v24_v9 = vld [vmem:[%s482_s1 + $0x18] sm:$0xff]  ;;  %v300_v58 = vshrl.u32 %v299_v57, 7 }
   0x4   :  { %74 = vperm.xlu0 %374, %v36_v5   ;;  %64 = vperm.xlu1 %375, %v34_v6   ;;  %v25_v10 = vld [vmem:[%s482_s1 + $0x20] sm:$0xff]  ;;  %v32_v11 = vld [vmem:[%s483_s2 + $0x18] sm:$0xff]  ;;  %v31_v12 = vld [vmem:[%s483_s2 + $0x10] sm:$0xff] }
   0x5   :  { %v26_v13 = vld [vmem:[%s482_s1 + $0x28] sm:$0xff]  ;;  %v27_v14 = vld [vmem:[%s482_s1 + $0x30] sm:$0xff]  ;;  %v29_v16 = vld [vmem:[%s483_s2] sm:$0xff]  ;;  %368 = vmatprep.mubr.msk.f32.mxu1 %vm380_vm1, %v379_v19  ;;  %vm302_vm3 = vcmp.lt.s32.totalorder %v300_v58, 2 }
   0x6   :  { %341 = vmatmul.mubr.msk.f32.vlgmr.msra.gmra.mxu0 %vm77_vm0, %v22_v3  ;;  %v30_v15 = vld [vmem:[%s483_s2 + $0x8] sm:$0xff]  ;;  %v28_v17 = vld [vmem:[%s482_s1 + $0x38] sm:$0xff]  ;;  %v219_v18 = vld [vmem:[%s484_s4] sm:$0xff] }
   0x7   :  { %343 = vmatprep.mubr.msk.f32.mxu0 %vm77_vm0, %v23_v4  ;;  %v218_v52 = vld [vmem:[%s485_s3] sm:$0xff] }
   0x8   :  { %69 = vperm.xlu0 %374, %v35_v7   ;;  %59 = vperm.xlu1 %375, %v33_v8  }
   0xa   :  { %344 = vmatmul.mubr.msk.f32.gmra.mxu0 %vm77_vm0, %v24_v9 }
   0xb   :  { %346 = vmatprep.mubr.msk.f32.mxu0 %vm77_vm0, %v25_v10 }
   0xc   :  { %54 = vperm.xlu0 %374, %v32_v11   ;;  %49 = vperm.xlu1 %375, %v31_v12  }
   0xe   :  { %347 = vmatmul.mubr.msk.f32.gmra.mxu0 %vm77_vm0, %v26_v13 }
   0xf   :  { %349 = vmatprep.mubr.msk.f32.mxu0 %vm77_vm0, %v27_v14 }
  0x10   :  { %44 = vperm.xlu0 %374, %v30_v15   ;;  %39 = vperm.xlu1 %375, %v29_v16  }
  0x12   :  { %350 = vmatmul.mubr.msk.f32.gmra.mxu0 %vm77_vm0, %v28_v17 }
  0x14   :  { %222 = vperm.xlu0 %374, %v219_v18  }
  0x7f   :  { %v75_v21 = vpop.permute.xlu0 %74  ;;  %v65_v23 = vpop.permute.xlu1 %64 }
  0x83   :  { %v70_v26 = vpop.permute.xlu0 %69  ;;  %v60_v28 = vpop.permute.xlu1 %59 }
  0x87   :  { %v55_v32 = vpop.permute.xlu0 %54  ;;  %v50_v37 = vpop.permute.xlu1 %49 }
  0x8b   :  { %v45_v42 = vpop.permute.xlu0 %44  ;;  %v40_v45 = vpop.permute.xlu1 %39 }
  0x8f   :  { %v223_v53 = vpop.permute.xlu0 %222 }
  0xc6   :  { %v342_v20 = vpop.f32.mrf.mxu0 }
  0xc7   :  { %v177_v46 = vadd.f32 %v342_v20, %v45_v42 }
  0xc8   :  { %v171_v22 = vpop.f32.mrf.mxu0 }
  0xc9   :  { %v172_v48 = vadd.f32 %v171_v22, %v40_v45  ;;  %v211_v50 = vmax.f32 %v177_v46, 0.0 }
  0xca   :  { %v345_v24 = vpop.f32.mrf.mxu0 }
  0xcb   :  { %v187_v40 = vadd.f32 %v345_v24, %v55_v32  ;;  %v210_v51 = vmax.f32 %v172_v48, 0.0 }
  0xcc   :  { %v181_v25 = vpop.f32.mrf.mxu0 }
  0xcd   :  { %v182_v43 = vadd.f32 %v181_v25, %v50_v37  ;;  %v213_v47 = vmax.f32 %v187_v40, 0.0 }
  0xce   :  { %v348_v27 = vpop.f32.mrf.mxu0 }
  0xcf   :  { %v197_v34 = vadd.f32 %v348_v27, %v65_v23  ;;  %v212_v49 = vmax.f32 %v182_v43, 0.0 }
  0xd0   :  { %v191_v29 = vpop.f32.mrf.mxu0 }
  0xd1   :  { %v192_v38 = vadd.f32 %v191_v29, %v60_v28  ;;  %v215_v41 = vmax.f32 %v197_v34, 0.0 }
  0xd2   :  { %v351_v30 = vpop.f32.mrf.mxu0 }
  0xd3   :  { %v207_v31 = vadd.f32 %v351_v30, %v75_v21  ;;  %v214_v44 = vmax.f32 %v192_v38, 0.0 }
  0xd4   :  { %v201_v33 = vpop.f32.mrf.mxu0 }
  0xd5   :  { %v217_v35 = vmax.f32 %v207_v31, 0.0  ;;  %v202_v36 = vadd.f32 %v201_v33, %v70_v26 }
  0xd7   :  { %v216_v39 = vmax.f32 %v202_v36, 0.0  ;;  %353 = vmatpush3.msra.mxu1 %v217_v35 }
  0xd8   :  { %354 = vmatprep.subr.mxu1 %v379_v19 }
  0xd9   :  { %355 = vmatpush3.msra.mxu1 %v216_v39 }
  0xda   :  { %356 = vmatprep.subr.mxu1 %v379_v19 }
  0xdb   :  { %357 = vmatpush3.msra.mxu1 %v215_v41 }
  0xdc   :  { %358 = vmatprep.subr.mxu1 %v379_v19 }
  0xdd   :  { %359 = vmatpush3.msra.mxu1 %v214_v44 }
  0xde   :  { %360 = vmatprep.subr.mxu1 %v379_v19 }
  0xdf   :  { %361 = vmatpush3.msra.mxu1 %v213_v47 }
  0xe0   :  { %362 = vmatprep.subr.mxu1 %v379_v19 }
  0xe1   :  { %363 = vmatpush3.msra.mxu1 %v212_v49 }
  0xe2   :  { %364 = vmatprep.subr.mxu1 %v379_v19 }
  0xe3   :  { %365 = vmatpush3.msra.mxu1 %v211_v50 }
  0xe4   :  { %366 = vmatprep.subr.mxu1 %v379_v19 }
  0xe5   :  { %367 = vmatpush3.msra.mxu1 %v210_v51 }
  0xe6   :  { %369 = vmatmul.mubr.msk.f32.vlgmr.msra.gmra.mxu1 %vm225_vm2, %v218_v52 }
 0x1a6   :  { %v295_v54 = vpop.f32.mrf.mxu1 }
 0x1a7   :  { %v296_v55 = vadd.f32 %v295_v54, %v223_v53 }
 0x1a8   :  { %v370_v56 = vpop.f32.mrf.mxu1 }
 0x1a9   :  { %376 = vtanh.f32 %v296_v55 }
 0x1b6   :  { %v377_v59 = vpop.eup %376 }
 0x1b7   :  { %v303_v60 = vsel %vm302_vm3, %v377_v59, %v296_v55 }
 0x1b8   :  { %305 = vst.msk [vmem:[%s486_s5] sm:$0xff] %vm304_vm4, %v303_v60 }

</bundles_post_ra>
